<compile_context>
chip_gen: v5e
topology: v5e:2x2
jax: 0.10.0
libtpu: 0.0.40
codegen_flags: <defaults>
</compile_context>

<pallas_src>
import functools

import jax
import jax.numpy as jnp
from jax import lax
from jax.experimental import pallas as pl
from jax.experimental.pallas import tpu as pltpu


def _round_up(v, m):
    return -(-v // m) * m


# ------------------------------ kernel helpers --------------------------------


def _conv_tile(x_ref, w_ref, rows, w_p):
    """3x3 conv on one row tile: 3 MXU matmuls with K = 3*c_in (tap folding)."""
    acc = jnp.dot(x_ref[0, 0, 0:rows, :], w_ref[0, :, :],
                  preferred_element_type=jnp.float32)
    for dy in (1, 2):
        start = dy * w_p                 # static, multiple of 8 -> sublane aligned
        acc = acc + jnp.dot(x_ref[0, 0, start:start + rows, :], w_ref[dy, :, :],
                            preferred_element_type=jnp.float32)
    return acc                           # (rows, c_out_p) f32


# ---------------- single-pass kernel (whole plane fits the VMEM budget) -------


def _conv_gn_relu_single_kernel(x_ref, w_ref, gamma_ref, beta_ref, gmat_ref,
                                gmat_t_ref, out_ref, *, rows, w_p, w_valid,
                                inv_cnt, eps):
    acc = _conv_tile(x_ref, w_ref, rows, w_p)

    gmat = gmat_ref[...]                 # (c_out_p, g_pad) one-hot channel->group
    gmat_t = gmat_t_ref[...]             # (g_pad, c_out_p)

    # Group mean (zero-padded positions / channels contribute exact zeros to the sum).
    s1 = jnp.sum(acc, axis=0, keepdims=True)                            # (1, C)
    gmean = jnp.dot(s1, gmat, preferred_element_type=jnp.float32) * inv_cnt
    mean_c = jnp.dot(gmean, gmat_t, preferred_element_type=jnp.float32)

    # Mean-shifted variance (numerically robust); mask lane-alignment pad columns.
    d = acc - mean_c
    if w_p > w_valid:
        col = lax.broadcasted_iota(jnp.int32, (rows, 1), 0) % w_p
        d = jnp.where(col < w_valid, d, 0.0)
    s2 = jnp.sum(d * d, axis=0, keepdims=True)
    gvar = jnp.dot(s2, gmat, preferred_element_type=jnp.float32) * inv_cnt
    ginv = lax.rsqrt(gvar + eps)
    inv_c = jnp.dot(ginv, gmat_t, preferred_element_type=jnp.float32)

    # Folded affine: one multiply-add + ReLU over the plane.
    scale_c = inv_c * gamma_ref[...]
    shift_c = beta_ref[...] - mean_c * scale_c
    y = jnp.maximum(acc * scale_c + shift_c, 0.0)
    out_ref[0, 0, :, :] = y.astype(out_ref.dtype)


# -------- two-pass (stats then normalize) kernel for spatially tiled planes ----


def _conv_gn_relu_tiled_kernel(x_ref, w_ref, gamma_ref, beta_ref, gmat_ref,
                               gmat_t_ref, out_ref, stat_ref, coef_ref, *,
                               rows, w_p, inv_cnt, eps):
    phase = pl.program_id(1)             # 0: accumulate stats, 1: normalize + store
    tile = pl.program_id(2)
    last = pl.num_programs(2) - 1

    acc = _conv_tile(x_ref, w_ref, rows, w_p)

    @pl.when(phase == 0)
    def _stats():
        @pl.when(tile == 0)
        def _init():
            stat_ref[...] = jnp.zeros_like(stat_ref)

        stat_ref[0:1, :] = stat_ref[0:1, :] + jnp.sum(acc, axis=0, keepdims=True)
        stat_ref[1:2, :] = stat_ref[1:2, :] + jnp.sum(acc * acc, axis=0,
                                                      keepdims=True)

        @pl.when(tile == last)
        def _finalize():
            gmat = gmat_ref[...]
            gmat_t = gmat_t_ref[...]
            gmean = jnp.dot(stat_ref[0:1, :], gmat,
                            preferred_element_type=jnp.float32) * inv_cnt
            gms = jnp.dot(stat_ref[1:2, :], gmat,
                          preferred_element_type=jnp.float32) * inv_cnt
            gvar = gms - gmean * gmean
            ginv = lax.rsqrt(gvar + eps)
            mean_c = jnp.dot(gmean, gmat_t, preferred_element_type=jnp.float32)
            inv_c = jnp.dot(ginv, gmat_t, preferred_element_type=jnp.float32)
            scale_c = inv_c * gamma_ref[...]
            coef_ref[0:1, :] = scale_c
            coef_ref[1:2, :] = beta_ref[...] - mean_c * scale_c

    @pl.when(phase == 1)
    def _normalize():
        y = jnp.maximum(acc * coef_ref[0:1, :] + coef_ref[1:2, :], 0.0)
        out_ref[0, 0, :, :] = y.astype(out_ref.dtype)


# ---------------------------------- wrapper ------------------------------------


def _build_im2col_tiles(x_nhwc, th, n_tiles, w_p, compute_dtype):
    """Width-im2col + per-row-tile slabs with a 2-row halo (pure XLA glue)."""
    n, h, w, c_in = x_nhwc.shape
    h_pad = th * n_tiles
    xp = jnp.pad(x_nhwc, ((0, 0), (1, 1 + h_pad - h), (1, 1), (0, 0)))
    # each output column packs the channels of columns x-1, x, x+1 (K = 3*c_in)
    xw = jnp.concatenate(
        [xp[:, :, 0:w, :], xp[:, :, 1:w + 1, :], xp[:, :, 2:w + 2, :]], axis=-1)
    if w_p > w:
        xw = jnp.pad(xw, ((0, 0), (0, 0), (0, w_p - w), (0, 0)))
    row_idx = jnp.arange(n_tiles)[:, None] * th + jnp.arange(th + 2)[None, :]
    xim = xw[:, row_idx]                                   # (n, T, th+2, w_p, 3c)
    return xim.reshape(n, n_tiles, (th + 2) * w_p, 3 * c_in).astype(compute_dtype)


def conv3x3_gn_relu(x, weight, gamma, beta, *, num_groups=32, eps=1e-5,
                    has_interpolate=True, tile_rows=None,
                    compute_dtype=jnp.bfloat16, nchw_output=True):
    """Pallas equivalent of Conv3x3GNReLU.forward for NCHW input x."""
    n, c_in, h, w = x.shape
    c_out = weight.shape[0]
    assert weight.shape == (c_out, c_in, 3, 3)
    assert c_out % num_groups == 0
    cpg = c_out // num_groups

    out_dtype = x.dtype
    in_bytes = jnp.dtype(compute_dtype).itemsize
    out_bytes = jnp.dtype(out_dtype).itemsize

    w_p = _round_up(w, 8)                 # aligned row stride (sublane-aligned shifts)
    c_out_p = _round_up(c_out, 128)       # lane-dense output store
    g_pad = c_out_p // cpg                # padded channels live in their own groups
    k3 = 3 * c_in
    lanes_k3 = _round_up(k3, 128)

    # --- per-generation VMEM budget -> row-tile size & vmem limit -------------
    try:
        vmem_cap = int(pltpu.get_tpu_info().vmem_capacity_bytes)
    except Exception:
        vmem_cap = 128 * 1024 * 1024
    if tile_rows is None:
        budget = vmem_cap // 4
        per_row = w_p * (2 * lanes_k3 * in_bytes      # input slab (double buffered)
                         + c_out_p * 4                # f32 accumulator
                         + 2 * c_out_p * out_bytes)   # output tile (double buffered)
        tile_rows = max(8, budget // max(per_row, 1))
    th = int(min(tile_rows, h))
    n_tiles = -(-h // th)
    rows = th * w_p
    slab = (th + 2) * w_p
    cnt = float(h * w * cpg)

    # --- wrapper-side layout plumbing (pure XLA glue) --------------------------
    x_nhwc = jnp.transpose(x, (0, 2, 3, 1))
    xim = _build_im2col_tiles(x_nhwc, th, n_tiles, w_p, compute_dtype)

    # OIHW -> (3, 3*c_in, c_out_p): tap dy, K packs (dx, c_in) to match the im2col.
    w_taps = jnp.transpose(weight, (2, 3, 1, 0)).reshape(3, k3, c_out)
    w_taps = jnp.pad(w_taps, ((0, 0), (0, 0),
                              (0, c_out_p - c_out))).astype(compute_dtype)

    gamma_p = jnp.pad(gamma.astype(jnp.float32),
                      (0, c_out_p - c_out)).reshape(1, c_out_p)
    beta_p = jnp.pad(beta.astype(jnp.float32),
                     (0, c_out_p - c_out)).reshape(1, c_out_p)

    gmat = (jnp.arange(c_out_p)[:, None] // cpg ==
            jnp.arange(g_pad)[None, :]).astype(jnp.float32)
    gmat_t = gmat.T

    need = (2 * slab * lanes_k3 * in_bytes
            + 2 * rows * c_out_p * out_bytes
            + 2 * rows * c_out_p * 4
            + 2 * 3 * _round_up(k3, 8) * c_out_p * in_bytes
            + 64 * (c_out_p + g_pad) * 4)
    vmem_limit = int(min(max(2 * need, 32 * 1024 * 1024), int(0.9 * vmem_cap)))
    vmem_limit = max(vmem_limit, int(need + (2 << 20)))

    n_passes = 1 if n_tiles == 1 else 2
    cost = pl.CostEstimate(
        flops=int(2 * n * n_tiles * n_passes * rows * 3 * k3 * c_out_p
                  + 4 * n * n_tiles * rows * c_out_p),
        transcendentals=int(n * g_pad),
        bytes_accessed=int(n * n_tiles * (n_passes * slab * k3 * in_bytes
                                          + rows * c_out_p * out_bytes)
                           + 3 * k3 * c_out_p * in_bytes))

    if n_tiles == 1:
        # Whole plane fits the budget: single pass, no conv recompute.
        kernel = functools.partial(
            _conv_gn_relu_single_kernel, rows=rows, w_p=w_p, w_valid=w,
            inv_cnt=1.0 / cnt, eps=float(eps))
        out = pl.pallas_call(
            kernel,
            out_shape=jax.ShapeDtypeStruct((n, 1, rows, c_out_p), out_dtype),
            grid=(n,),
            in_specs=[
                pl.BlockSpec((1, 1, slab, k3), lambda b: (b, 0, 0, 0)),
                pl.BlockSpec((3, k3, c_out_p), lambda b: (0, 0, 0)),
                pl.BlockSpec((1, c_out_p), lambda b: (0, 0)),
                pl.BlockSpec((1, c_out_p), lambda b: (0, 0)),
                pl.BlockSpec((c_out_p, g_pad), lambda b: (0, 0)),
                pl.BlockSpec((g_pad, c_out_p), lambda b: (0, 0)),
            ],
            out_specs=pl.BlockSpec((1, 1, rows, c_out_p), lambda b: (b, 0, 0, 0)),
            compiler_params=pltpu.CompilerParams(
                dimension_semantics=("parallel",),
                vmem_limit_bytes=vmem_limit),
            cost_estimate=cost,
        )(xim, w_taps, gamma_p, beta_p, gmat, gmat_t)
    else:
        # Spatially tiled: phase 0 accumulates per-channel s1/s2 into scratch,
        # phase 1 normalizes + stores.
        kernel = functools.partial(
            _conv_gn_relu_tiled_kernel, rows=rows, w_p=w_p,
            inv_cnt=1.0 / cnt, eps=float(eps))
        out = pl.pallas_call(
            kernel,
            out_shape=jax.ShapeDtypeStruct((n, n_tiles, rows, c_out_p), out_dtype),
            grid=(n, 2, n_tiles),
            in_specs=[
                pl.BlockSpec((1, 1, slab, k3), lambda b, p_, t: (b, t, 0, 0)),
                pl.BlockSpec((3, k3, c_out_p), lambda b, p_, t: (0, 0, 0)),
                pl.BlockSpec((1, c_out_p), lambda b, p_, t: (0, 0)),
                pl.BlockSpec((1, c_out_p), lambda b, p_, t: (0, 0)),
                pl.BlockSpec((c_out_p, g_pad), lambda b, p_, t: (0, 0)),
                pl.BlockSpec((g_pad, c_out_p), lambda b, p_, t: (0, 0)),
            ],
            # Phase 0 parks on tile 0's (never-written) block so the stats pass adds
            # no output HBM traffic; phase 1 writes each tile's block exactly once.
            out_specs=pl.BlockSpec((1, 1, rows, c_out_p),
                                   lambda b, p_, t: (b, p_ * t, 0, 0)),
            scratch_shapes=[pltpu.VMEM((2, c_out_p), jnp.float32),   # s1 / s2
                            pltpu.VMEM((2, c_out_p), jnp.float32)],  # scale / shift
            compiler_params=pltpu.CompilerParams(
                dimension_semantics=("parallel", "arbitrary", "arbitrary"),
                vmem_limit_bytes=vmem_limit),
            cost_estimate=cost,
        )(xim, w_taps, gamma_p, beta_p, gmat, gmat_t)

    # --- strip padding, fuse the 2x nearest upsample into the layout glue ------
    y_nhwc = out.reshape(n, n_tiles * th, w_p, c_out_p)[:, :h, :w, :c_out]
    if has_interpolate:
        y_nhwc = jnp.broadcast_to(
            y_nhwc[:, :, None, :, None, :],
            (n, h, 2, w, 2, c_out)).reshape(n, 2 * h, 2 * w, c_out)
    if nchw_output:
        return jnp.transpose(y_nhwc, (0, 3, 1, 2))
    return y_nhwc


# --------------------------------- reference ------------------------------------


def _ref_conv3x3_gn_relu(x, weight, gamma, beta, num_groups=32, eps=1e-5,
                         has_interpolate=True):
    y = lax.conv_general_dilated(
        x, weight, window_strides=(1, 1), padding="SAME",
        dimension_numbers=("NCHW", "OIHW", "NCHW"),
        precision=lax.Precision.HIGHEST)
    n, c, h, w = y.shape
    yg = y.reshape(n, num_groups, c // num_groups, h, w)
    mean = yg.mean(axis=(2, 3, 4), keepdims=True)
    var = yg.var(axis=(2, 3, 4), keepdims=True)
    yn = ((yg - mean) / jnp.sqrt(var + eps)).reshape(n, c, h, w)
    yn = yn * gamma[None, :, None, None] + beta[None, :, None, None]
    yn = jnp.maximum(yn, 0.0)
    if has_interpolate:
        yn = jnp.repeat(jnp.repeat(yn, 2, axis=2), 2, axis=3)
    return yn


# -------------------------------- demo / check ----------------------------------


if __name__ == "__main__":
    key = jax.random.PRNGKey(0)
    kx, kw, kg, kb = jax.random.split(key, 4)

    n, c_in, c_out, h, w = 2, 4, 32, 16, 16     # c_out=32: minimum for GroupNorm(32, .)
    x = jax.random.normal(kx, (n, c_in, h, w), jnp.float32)
    weight = 0.1 * jax.random.normal(kw, (c_out, c_in, 3, 3), jnp.float32)
    gamma = 1.0 + 0.1 * jax.random.normal(kg, (c_out,), jnp.float32)
    beta = 0.1 * jax.random.normal(kb, (c_out,), jnp.float32)

    ref_up = _ref_conv3x3_gn_relu(x, weight, gamma, beta, has_interpolate=True)
    ref_no = _ref_conv3x3_gn_relu(x, weight, gamma, beta, has_interpolate=False)

    # 1) auto tiling (plane fits -> single-pass kernel), has_interpolate=True (default)
    out = jax.block_until_ready(
        conv3x3_gn_relu(x, weight, gamma, beta, has_interpolate=True))
    assert out.shape == (n, c_out, 2 * h, 2 * w)
    assert jnp.allclose(out, ref_up, atol=2e-2, rtol=2e-2), float(
        jnp.max(jnp.abs(out - ref_up)))

    # 2) forced spatial tiling -> two-pass GroupNorm kernel (v7x VMEM path)
    out_t = jax.block_until_ready(
        conv3x3_gn_relu(x, weight, gamma, beta, has_interpolate=True, tile_rows=8))
    assert out_t.shape == (n, c_out, 2 * h, 2 * w)
    assert jnp.allclose(out_t, ref_up, atol=2e-2, rtol=2e-2), float(
        jnp.max(jnp.abs(out_t - ref_up)))

    # 3) has_interpolate=False branch
    out_n = jax.block_until_ready(
        conv3x3_gn_relu(x, weight, gamma, beta, has_interpolate=False))
    assert out_n.shape == (n, c_out, h, w)
    assert jnp.allclose(out_n, ref_no, atol=2e-2, rtol=2e-2), float(
        jnp.max(jnp.abs(out_n - ref_no)))

    print("KERNEL_OK")
</pallas_src>

<mosaic_0001>
module attributes {stable_mosaic.version = 11 : i64} {
  func.func @_conv_gn_relu_single_kernel(%arg0: i32, %arg1: memref<1x1x288x12xbf16, #tpu.memory_space<vmem>>, %arg2: memref<3x12x128xbf16, #tpu.memory_space<vmem>>, %arg3: memref<1x128xf32, #tpu.memory_space<vmem>>, %arg4: memref<1x128xf32, #tpu.memory_space<vmem>>, %arg5: memref<128x128xf32, #tpu.memory_space<vmem>>, %arg6: memref<128x128xf32, #tpu.memory_space<vmem>>, %arg7: memref<1x1x256x128xf32, #tpu.memory_space<vmem>>) attributes {dimension_semantics = [#tpu.dimension_semantics<parallel>], iteration_bounds = array<i64: 2>, scalar_prefetch = 0 : i64, scratch_operands = 0 : i64, tpu.core_type = #tpu.core_type<tc>, window_params = [{transform_indices = @transform_0, window_bounds = array<i64: 1, 1, 288, 12>}, {pipeline_mode = #tpu.pipeline_mode<synchronous>, transform_indices = @transform_1, window_bounds = array<i64: 3, 12, 128>}, {pipeline_mode = #tpu.pipeline_mode<synchronous>, transform_indices = @transform_2, window_bounds = array<i64: 1, 128>}, {pipeline_mode = #tpu.pipeline_mode<synchronous>, transform_indices = @transform_3, window_bounds = array<i64: 1, 128>}, {pipeline_mode = #tpu.pipeline_mode<synchronous>, transform_indices = @transform_4, window_bounds = array<i64: 128, 128>}, {pipeline_mode = #tpu.pipeline_mode<synchronous>, transform_indices = @transform_5, window_bounds = array<i64: 128, 128>}, {transform_indices = @transform_6, window_bounds = array<i64: 1, 1, 256, 128>}]} {
    %c0 = arith.constant 0 : index
    %c0_0 = arith.constant 0 : index
    %c0_1 = arith.constant 0 : index
    %c0_2 = arith.constant 0 : index
    %0 = vector.load %arg1[%c0, %c0_0, %c0_1, %c0_2] : memref<1x1x288x12xbf16, #tpu.memory_space<vmem>>, vector<1x1x256x12xbf16>
    %1 = vector.shape_cast %0 : vector<1x1x256x12xbf16> to vector<256x12xbf16>
    %c0_3 = arith.constant 0 : index
    %c0_4 = arith.constant 0 : index
    %c0_5 = arith.constant 0 : index
    %2 = vector.load %arg2[%c0_3, %c0_4, %c0_5] : memref<3x12x128xbf16, #tpu.memory_space<vmem>>, vector<1x12x128xbf16>
    %3 = vector.shape_cast %2 : vector<1x12x128xbf16> to vector<12x128xbf16>
    %cst = arith.constant dense<0.000000e+00> : vector<256x128xf32>
    %4 = tpu.matmul %1, %3, %cst {dimension_numbers = #tpu.dot_dimension_numbers<[1], [0], [0], [1], [0, 0, 1, 1], [], []>} : vector<256x12xbf16>, vector<12x128xbf16>, vector<256x128xf32> -> vector<256x128xf32>
    %c0_6 = arith.constant 0 : index
    %c0_7 = arith.constant 0 : index
    %c16 = arith.constant 16 : index
    %c0_8 = arith.constant 0 : index
    %5 = vector.load %arg1[%c0_6, %c0_7, %c16, %c0_8] : memref<1x1x288x12xbf16, #tpu.memory_space<vmem>>, vector<1x1x256x12xbf16>
    %6 = vector.shape_cast %5 : vector<1x1x256x12xbf16> to vector<256x12xbf16>
    %c1 = arith.constant 1 : index
    %c0_9 = arith.constant 0 : index
    %c0_10 = arith.constant 0 : index
    %7 = vector.load %arg2[%c1, %c0_9, %c0_10] : memref<3x12x128xbf16, #tpu.memory_space<vmem>>, vector<1x12x128xbf16>
    %8 = vector.shape_cast %7 : vector<1x12x128xbf16> to vector<12x128xbf16>
    %cst_11 = arith.constant dense<0.000000e+00> : vector<256x128xf32>
    %9 = tpu.matmul %6, %8, %cst_11 {dimension_numbers = #tpu.dot_dimension_numbers<[1], [0], [0], [1], [0, 0, 1, 1], [], []>} : vector<256x12xbf16>, vector<12x128xbf16>, vector<256x128xf32> -> vector<256x128xf32>
    %10 = arith.addf %4, %9 : vector<256x128xf32>
    %c0_12 = arith.constant 0 : index
    %c0_13 = arith.constant 0 : index
    %c32 = arith.constant 32 : index
    %c0_14 = arith.constant 0 : index
    %11 = vector.load %arg1[%c0_12, %c0_13, %c32, %c0_14] : memref<1x1x288x12xbf16, #tpu.memory_space<vmem>>, vector<1x1x256x12xbf16>
    %12 = vector.shape_cast %11 : vector<1x1x256x12xbf16> to vector<256x12xbf16>
    %c2 = arith.constant 2 : index
    %c0_15 = arith.constant 0 : index
    %c0_16 = arith.constant 0 : index
    %13 = vector.load %arg2[%c2, %c0_15, %c0_16] : memref<3x12x128xbf16, #tpu.memory_space<vmem>>, vector<1x12x128xbf16>
    %14 = vector.shape_cast %13 : vector<1x12x128xbf16> to vector<12x128xbf16>
    %cst_17 = arith.constant dense<0.000000e+00> : vector<256x128xf32>
    %15 = tpu.matmul %12, %14, %cst_17 {dimension_numbers = #tpu.dot_dimension_numbers<[1], [0], [0], [1], [0, 0, 1, 1], [], []>} : vector<256x12xbf16>, vector<12x128xbf16>, vector<256x128xf32> -> vector<256x128xf32>
    %16 = arith.addf %10, %15 : vector<256x128xf32>
    %c0_18 = arith.constant 0 : index
    %c0_19 = arith.constant 0 : index
    %17 = vector.load %arg5[%c0_18, %c0_19] : memref<128x128xf32, #tpu.memory_space<vmem>>, vector<128x128xf32>
    %c0_20 = arith.constant 0 : index
    %c0_21 = arith.constant 0 : index
    %18 = vector.load %arg6[%c0_20, %c0_21] : memref<128x128xf32, #tpu.memory_space<vmem>>, vector<128x128xf32>
    %cst_22 = arith.constant dense<0.000000e+00> : vector<128xf32>
    %19 = vector.multi_reduction <add>, %16, %cst_22 [0] : vector<256x128xf32> to vector<128xf32>
    %20 = vector.shape_cast %19 : vector<128xf32> to vector<1x128xf32>
    %cst_23 = arith.constant dense<0.000000e+00> : vector<1x128xf32>
    %21 = tpu.matmul %20, %17, %cst_23 {dimension_numbers = #tpu.dot_dimension_numbers<[1], [0], [0], [1], [0, 0, 1, 1], [], []>} : vector<1x128xf32>, vector<128x128xf32>, vector<1x128xf32> -> vector<1x128xf32>
    %cst_24 = arith.constant 3.906250e-03 : f32
    %22 = vector.broadcast %cst_24 : f32 to vector<1x128xf32>
    %23 = arith.mulf %21, %22 : vector<1x128xf32>
    %cst_25 = arith.constant dense<0.000000e+00> : vector<1x128xf32>
    %24 = tpu.matmul %23, %18, %cst_25 {dimension_numbers = #tpu.dot_dimension_numbers<[1], [0], [0], [1], [0, 0, 1, 1], [], []>} : vector<1x128xf32>, vector<128x128xf32>, vector<1x128xf32> -> vector<1x128xf32>
    %25 = vector.broadcast %24 : vector<1x128xf32> to vector<256x128xf32>
    %26 = arith.subf %16, %25 : vector<256x128xf32>
    %27 = arith.mulf %26, %26 : vector<256x128xf32>
    %cst_26 = arith.constant dense<0.000000e+00> : vector<128xf32>
    %28 = vector.multi_reduction <add>, %27, %cst_26 [0] : vector<256x128xf32> to vector<128xf32>
    %29 = vector.shape_cast %28 : vector<128xf32> to vector<1x128xf32>
    %cst_27 = arith.constant dense<0.000000e+00> : vector<1x128xf32>
    %30 = tpu.matmul %29, %17, %cst_27 {dimension_numbers = #tpu.dot_dimension_numbers<[1], [0], [0], [1], [0, 0, 1, 1], [], []>} : vector<1x128xf32>, vector<128x128xf32>, vector<1x128xf32> -> vector<1x128xf32>
    %cst_28 = arith.constant 3.906250e-03 : f32
    %31 = vector.broadcast %cst_28 : f32 to vector<1x128xf32>
    %32 = arith.mulf %30, %31 : vector<1x128xf32>
    %cst_29 = arith.constant 9.99999974E-6 : f32
    %33 = vector.broadcast %cst_29 : f32 to vector<1x128xf32>
    %34 = arith.addf %32, %33 : vector<1x128xf32>
    %35 = math.rsqrt %34 : vector<1x128xf32>
    %cst_30 = arith.constant dense<0.000000e+00> : vector<1x128xf32>
    %36 = tpu.matmul %35, %18, %cst_30 {dimension_numbers = #tpu.dot_dimension_numbers<[1], [0], [0], [1], [0, 0, 1, 1], [], []>} : vector<1x128xf32>, vector<128x128xf32>, vector<1x128xf32> -> vector<1x128xf32>
    %c0_31 = arith.constant 0 : index
    %c0_32 = arith.constant 0 : index
    %37 = vector.load %arg3[%c0_31, %c0_32] : memref<1x128xf32, #tpu.memory_space<vmem>>, vector<1x128xf32>
    %38 = arith.mulf %36, %37 : vector<1x128xf32>
    %c0_33 = arith.constant 0 : index
    %c0_34 = arith.constant 0 : index
    %39 = vector.load %arg4[%c0_33, %c0_34] : memref<1x128xf32, #tpu.memory_space<vmem>>, vector<1x128xf32>
    %40 = arith.mulf %24, %38 : vector<1x128xf32>
    %41 = arith.subf %39, %40 : vector<1x128xf32>
    %42 = vector.broadcast %38 : vector<1x128xf32> to vector<256x128xf32>
    %43 = arith.mulf %16, %42 : vector<256x128xf32>
    %44 = vector.broadcast %41 : vector<1x128xf32> to vector<256x128xf32>
    %45 = arith.addf %43, %44 : vector<256x128xf32>
    %cst_35 = arith.constant 0.000000e+00 : f32
    %46 = vector.broadcast %cst_35 : f32 to vector<256x128xf32>
    %47 = arith.maximumf %45, %46 : vector<256x128xf32>
    %c0_36 = arith.constant 0 : index
    %c0_37 = arith.constant 0 : index
    %c0_38 = arith.constant 0 : index
    %c0_39 = arith.constant 0 : index
    %48 = vector.load %arg7[%c0_36, %c0_37, %c0_38, %c0_39] : memref<1x1x256x128xf32, #tpu.memory_space<vmem>>, vector<1x1x256x128xf32>
    %49 = vector.shape_cast %48 : vector<1x1x256x128xf32> to vector<256x128xf32>
    %50 = vector.shape_cast %47 : vector<256x128xf32> to vector<1x1x256x128xf32>
    tpu.vector_store %arg7[%c0_36, %c0_37, %c0_38, %c0_39], %50 {strides = array<i32>} : memref<1x1x256x128xf32, #tpu.memory_space<vmem>>, vector<1x1x256x128xf32>,
    return
  }
  func.func @transform_0(%arg0: i32) -> (i32, i32, i32, i32) {
    %c0_i32 = arith.constant 0 : i32
    %c0_i32_0 = arith.constant 0 : i32
    %c0_i32_1 = arith.constant 0 : i32
    %c0_i32_2 = arith.constant 0 : i32
    return %arg0, %c0_i32, %c0_i32_0, %c0_i32_1 : i32, i32, i32, i32
  }
  func.func @transform_1(%arg0: i32) -> (i32, i32, i32) {
    %c0_i32 = arith.constant 0 : i32
    %c0_i32_0 = arith.constant 0 : i32
    %c0_i32_1 = arith.constant 0 : i32
    %c0_i32_2 = arith.constant 0 : i32
    return %c0_i32, %c0_i32_0, %c0_i32_1 : i32, i32, i32
  }
  func.func @transform_2(%arg0: i32) -> (i32, i32) {
    %c0_i32 = arith.constant 0 : i32
    %c0_i32_0 = arith.constant 0 : i32
    %c0_i32_1 = arith.constant 0 : i32
    return %c0_i32, %c0_i32_0 : i32, i32
  }
  func.func @transform_3(%arg0: i32) -> (i32, i32) {
    %c0_i32 = arith.constant 0 : i32
    %c0_i32_0 = arith.constant 0 : i32
    %c0_i32_1 = arith.constant 0 : i32
    return %c0_i32, %c0_i32_0 : i32, i32
  }
  func.func @transform_4(%arg0: i32) -> (i32, i32) {
    %c0_i32 = arith.constant 0 : i32
    %c0_i32_0 = arith.constant 0 : i32
    %c0_i32_1 = arith.constant 0 : i32
    return %c0_i32, %c0_i32_0 : i32, i32
  }
  func.func @transform_5(%arg0: i32) -> (i32, i32) {
    %c0_i32 = arith.constant 0 : i32
    %c0_i32_0 = arith.constant 0 : i32
    %c0_i32_1 = arith.constant 0 : i32
    return %c0_i32, %c0_i32_0 : i32, i32
  }
  func.func @transform_6(%arg0: i32) -> (i32, i32, i32, i32) {
    %c0_i32 = arith.constant 0 : i32
    %c0_i32_0 = arith.constant 0 : i32
    %c0_i32_1 = arith.constant 0 : i32
    %c0_i32_2 = arith.constant 0 : i32
    return %arg0, %c0_i32, %c0_i32_0, %c0_i32_1 : i32, i32, i32, i32
  }
}

</mosaic_0001>

<bundles_post_ra>
// kernel: tpu_custom_call.1
= control target key start
LH: loop header
LB: loop body
LE: loop exit
PB: predicated region body
PF: predicated region fallthrough
CT: control target
= control target key end

     0   :  { %11 = vsyncpa [#allocation3], 0  ;;  %s2545_s0 = inlined_call_operand.vmem [shape: bf16[2,1,288,12], index: 0, kind: input, shape index: {}]   ;;  %s2546_s1 = inlined_call_operand.vmem [shape: bf16[3,12,128], index: 1, kind: input, shape index: {}]   ;;  %s2547_s2 = inlined_call_operand.vmem [shape: f32[1,128], index: 2, kind: input, shape index: {}]   ;;  %s2548_s3 = inlined_call_operand.vmem [shape: f32[1,128], index: 3, kind: input, shape index: {}]   ;;  %s2549_s4 = inlined_call_operand.vmem [shape: f32[128,128], index: 4, kind: input, shape index: {}]   ;;  %s2550_s5 = inlined_call_operand.vmem [shape: f32[128,128], index: 5, kind: input, shape index: {}]   ;;  %s2551_s6 = inlined_call_operand.hbm [shape: f32[2,1,256,128], index: 6, kind: output, shape index: {}]  }
   0x1   :  { %13 = vsyncpa [#allocation3 + $0x1], 0  ;;  %s1785_s21 = smov 0   ;;  %s1787_s22 = smov 0  }
   0x2   :  { %s1789_s23 = smov 0   ;;  %s1791_s24 = smov 0  }
   0x3 LB: > { %s1806_s25 = sadd.s32 4294967295, %s1746_s24   ;;  %s1393_s26 = sadd.s32 4294967294, %s1746_s24   ;;  %s1746_s24 = sphi %s1791_s24, %s2577_s24   ;;  %s1742_s23 = sphi %s1789_s23, %s2576_s23   ;;  %s1738_s22 = sphi %s1787_s22, %s2575_s22   ;;  %s1734_s21 = sphi %s1785_s21, %s2574_s21  }
   0x4   : > { %s1810_s27 = sadd.s32 1, %s1746_s24   ;;  %s157_s28 = sadd.s32 1, %s1742_s23 }
   0x5   : > { %s154_s29 = ssub.s32 %s1746_s24, %s1810_s27  ;;  %p167_p0 = scmp.ne.s32.totalorder %s1742_s23, %s1738_s22 }
   0x6   : > { %p155_p1 = scmp.eq.s32.totalorder %s154_s29, 0  ;;  %p168_p2 = scmp.eq.s32.totalorder %s1806_s25, 1 }
   0x7   : > { %p173_p3 = scmp.ne.s32.totalorder %s1738_s22, %s1734_s21  ;;  %p174_p4 = scmp.eq.s32.totalorder %s1393_s26, 1 }
   0x8   : > { %s1821_s30 = scalar_select %p155_p1, %s1742_s23, %s157_s28  }
   0x9   : > { %p1823_p5 = por %p168_p2, %p167_p0  ;;  %p1827_p6 = por %p174_p4, %p173_p3 }
   0xa   : > { %p1396_p7 = scmp.ge.s32.totalorder %s1746_s24, 1  ;;  %p215_p8 = scmp.lt.s32.totalorder %s1746_s24, 3 }
   0xc   : > { %p216_p9 = pnand %p1396_p7, %p215_p8 }
   0xe   : > { %219 = sbr.rel (%p216_p9) target bundleno = 1079 (0x437), region = 44 }
  0x13   : > { %v1467_v0 = vld [vmem:[%s2546_s1 + $0x8] sm:$0xf]  ;;  %v1618_v1 = vld [vmem:[%s2546_s1 + $0x8] sm:$0x30]  ;;  %vm424_vm0 = vcmask 1045504   ;;  %p245_p10 = scmp.lt.s32.totalorder %s1806_s25, 1 }
  0x14   : > { %v1468_v2 = vor.u32 %v1618_v1, %v1467_v0  ;;  %v1491_v3 = vld [vmem:[%s2546_s1] sm:$0xf]  ;;  %v1616_v4 = vld [vmem:[%s2546_s1] sm:$0x30]  ;;  %v1577_v5 = vld [vmem:[%s2546_s1 + $0x10] sm:$0xf] }
  0x15   : > { %v1492_v6 = vor.u32 %v1616_v4, %v1491_v3  ;;  %v1635_v7 = vld [vmem:[%s2546_s1 + $0x10] sm:$0x30]  ;;  %s246_s26 = scalar_select %p245_p10, %s1806_s25, 1  ;;  %vm375_vm1 = vcmask 97280  }
  0x16   : > { %v426_v8 = vsel %vm424_vm0, %v1468_v2, 0  ;;  %v1578_v9 = vor.u32 %v1635_v7, %v1577_v5  ;;  %s242_s19 = sand.u32 1, %s1738_s22   ;;  %s1704_s17 = scalar_lea.hbm %s2551_s6, 512 }
  0x17   : > { %435 = vmatpush.bf16.msra.mxu0 %v426_v8  ;;  %v531_v10 = vsel %vm424_vm0, %v1492_v6, 0  ;;  %s1640_s28 = smul.u32 144, %s246_s26  ;;  %1637 = vmatpush.bf16.msra.mxu3 %v426_v8  ;;  %s1397_s20 = sshll.u32 %s242_s19, 8 }
  0x18   : > { %540 = vmatpush.bf16.msra.mxu1 %v531_v10  ;;  %v791_v11 = vsel %vm424_vm0, %v1578_v9, 0  ;;  %s2412_s26 = scalar_lea.vmem [#allocation2], %s1397_s20  ;;  %s1316_s12 = scalar_lea.sflag [#allocation3], %s242_s19 }
  0x19   : > { %800 = vmatpush.bf16.msra.mxu2 %v791_v11  ;;  %s1859_s10 = scalar_lea.vmem %s2545_s0, %s1640_s28  ;;  %s1636_s28 = sshll.u32 %s1806_s25, 8 }
  0x1a   : > { %v1601_v12 = vld [vmem:[%s1859_s10 + $0x8] sm:$0xff]  ;;  %v1600_v13 = vld [vmem:[%s1859_s10] sm:$0xff]  ;;  %v1619_v14 = vld [vmem:[%s1859_s10 + $0x10] sm:$0xff]  ;;  %s1327_s9 = scalar_lea.hbm %s2551_s6, %s1636_s28 }
  0x1b   : > { %1638 = vmatpush.bf16.msrb.mxu3 %v531_v10  ;;  %1469 = vmatmul.msk.bf16.vlgmr.msra.gmra.mxu0 %vm375_vm1, %v1601_v12  ;;  %v1602_v15 = vld [vmem:[%s1859_s10 + $0x10] sm:$0xff]  ;;  %v1620_v16 = vld [vmem:[%s1859_s10 + $0x18] sm:$0xff]  ;;  %v1621_v18 = vld [vmem:[%s1859_s10 + $0x20] sm:$0xff]  ;;  %s1330_s11 = sshll.u32 %s1327_s9, 4  ;;  %s1331_s11 = int_to_ptr.hbm [resolvable:$true] %s1330_s11 }
  0x1c   : > { %1493 = vmatmul.msk.bf16.vlgmr.msra.gmra.mxu1 %vm375_vm1, %v1600_v13  ;;  %1579 = vmatmul.msk.bf16.vlgmr.msra.gmra.mxu2 %vm375_vm1, %v1619_v14  ;;  %v1603_v17 = vld [vmem:[%s1859_s10 + $0x18] sm:$0xff]  ;;  %v1604_v20 = vld [vmem:[%s1859_s10 + $0x20] sm:$0xff]  ;;  %v1622_v21 = vld [vmem:[%s1859_s10 + $0x28] sm:$0xff]  ;;  %s1698_s13 = sshra.s32 %s1331_s11, 4  ;;  %s1699_s13 = int_to_ptr.hbm [resolvable:$true] %s1698_s13 }
  0x1d   : > { %v1615_v19 = vld [vmem:[%s1859_s10 + $0x78] sm:$0xff]  ;;  %v1617_v22 = vld [vmem:[%s1859_s10 + $0x80] sm:$0xff]  ;;  %v1605_v23 = vld [vmem:[%s1859_s10 + $0x28] sm:$0xff]  ;;  %s1700_s14 = scalar_lea.hbm %s1699_s13, 256  ;;  %p1705_p0 = scmp.lt.s32.totalorder %s1699_s13, %s2551_s6 }
  0x1e   : > { %1483 = vmatmul.msk.bf16.vlgmr.msra.gmra.mxu3 %vm375_vm1, %v1615_v19  ;;  %v1623_v24 = vld [vmem:[%s1859_s10 + $0x30] sm:$0xff]  ;;  %v1624_v27 = vld [vmem:[%s1859_s10 + $0x38] sm:$0xff]  ;;  %v1625_v29 = vld [vmem:[%s1859_s10 + $0x40] sm:$0xff]  ;;  %p1701_p11 = scmp.ne.s32.totalorder %s1699_s13, %s1700_s14  ;;  %p1706_p1 = scmp.lt.s32.totalorder %s1704_s17, %s1700_s14 }
  0x1f   : > { %1639 = vmatpush.bf16.msra.mxu3 %v791_v11  ;;  %v1892_v25 = vld [vmem:[%s1859_s10 + $0x70] sm:$0xff]  ;;  %v1607_v28 = vld [vmem:[%s1859_s10 + $0x38] sm:$0xff]  ;;  %v1633_v30 = vld [vmem:[%s1859_s10 + $0x80] sm:$0xff] }
  0x20   : > { %v1606_v26 = vld [vmem:[%s1859_s10 + $0x30] sm:$0xff]  ;;  %v1608_v31 = vld [vmem:[%s1859_s10 + $0x40] sm:$0xff]  ;;  %v1626_v32 = vld [vmem:[%s1859_s10 + $0x48] sm:$0xff]  ;;  %p1702_p12 = pnand %p1701_p11, %p1823_p5  ;;  %p1707_p2 = por %p1706_p1, %p1705_p0 }
  0x21   : > { %v1634_v33 = vld [vmem:[%s1859_s10 + $0x88] sm:$0xff]  ;;  %v1627_v37 = vld [vmem:[%s1859_s10 + $0x50] sm:$0xff]  ;;  %v1628_v49 = vld [vmem:[%s1859_s10 + $0x58] sm:$0xff] }
  0x22   : > { %v1609_v34 = vld [vmem:[%s1859_s10 + $0x48] sm:$0xff]  ;;  %v1610_v45 = vld [vmem:[%s1859_s10 + $0x50] sm:$0xff]  ;;  %v1611_v57 = vld [vmem:[%s1859_s10 + $0x58] sm:$0xff]  ;;  %p1703_p13 = pneg %p1702_p12 }
  0x23   : > { %v1629_v61 = vld [vmem:[%s1859_s10 + $0x60] sm:$0xff]  ;;  %v1630_v9 = vld [vmem:[%s1859_s10 + $0x68] sm:$0xff] }
  0x24   : > { %v1612_v5 = vld [vmem:[%s1859_s10 + $0x60] sm:$0xff]  ;;  %p1708_p3 = pnand %p1707_p2, %p1703_p13 }
  0x2b   : > { %1470 = vmatmul.msk.bf16.gmra.mxu0 %vm375_vm1, %v1602_v15 }
  0x2c   : > { %1494 = vmatmul.msk.bf16.gmra.mxu1 %vm375_vm1, %v1601_v12  ;;  %1580 = vmatmul.msk.bf16.gmra.mxu2 %vm375_vm1, %v1620_v16 }
  0x2e   : > { %1484 = vmatmul.msk.bf16.gmra.mxu3 %vm375_vm1, %v1617_v22 }
  0x3b   : > { %1471 = vmatmul.msk.bf16.gmra.mxu0 %vm375_vm1, %v1603_v17 }
  0x3c   : > { %1495 = vmatmul.msk.bf16.gmra.mxu1 %vm375_vm1, %v1602_v15  ;;  %1581 = vmatmul.msk.bf16.gmra.mxu2 %vm375_vm1, %v1621_v18 }
  0x3e   : > { %1507 = vmatmul.msk.bf16.vlgmr.msrb.gmra.mxu3 %vm375_vm1, %v1892_v25 }
  0x4b   : > { %1472 = vmatmul.msk.bf16.gmra.mxu0 %vm375_vm1, %v1604_v20 }
  0x4c   : > { %1496 = vmatmul.msk.bf16.gmra.mxu1 %vm375_vm1, %v1603_v17  ;;  %1582 = vmatmul.msk.bf16.gmra.mxu2 %vm375_vm1, %v1622_v21  ;;  %v1613_v17 = vld [vmem:[%s1859_s10 + $0x68] sm:$0xff]  ;;  %v1631_v21 = vld [vmem:[%s1859_s10 + $0x70] sm:$0xff] }
  0x4e   : > { %1508 = vmatmul.msk.bf16.gmra.mxu3 %vm375_vm1, %v1615_v19 }
  0x5b   : > { %1473 = vmatmul.msk.bf16.gmra.mxu0 %vm375_vm1, %v1605_v23 }
  0x5c   : > { %1497 = vmatmul.msk.bf16.gmra.mxu1 %vm375_vm1, %v1604_v20  ;;  %1583 = vmatmul.msk.bf16.gmra.mxu2 %vm375_vm1, %v1623_v24 }
  0x5e   : > { %1593 = vmatmul.msk.bf16.vlgmr.msra.gmra.mxu3 %vm375_vm1, %v1633_v30 }
  0x6b   : > { %1474 = vmatmul.msk.bf16.gmra.mxu0 %vm375_vm1, %v1606_v26 }
  0x6c   : > { %1498 = vmatmul.msk.bf16.gmra.mxu1 %vm375_vm1, %v1605_v23  ;;  %1584 = vmatmul.msk.bf16.gmra.mxu2 %vm375_vm1, %v1624_v27 }
  0x6e   : > { %1594 = vmatmul.msk.bf16.gmra.mxu3 %vm375_vm1, %v1634_v33  ;;  %v1632_v33 = vld [vmem:[%s1859_s10 + $0x78] sm:$0xff]  ;;  %s1328_s10 = sshll.u32 %s2412_s26, 4  ;;  %s1329_s10 = int_to_ptr.vmem [resolvable:$true] %s1328_s10 }
  0x7b   : > { %1475 = vmatmul.msk.bf16.gmra.mxu0 %vm375_vm1, %v1607_v28 }
  0x7c   : > { %1499 = vmatmul.msk.bf16.gmra.mxu1 %vm375_vm1, %v1606_v26  ;;  %1585 = vmatmul.msk.bf16.gmra.mxu2 %vm375_vm1, %v1625_v29 }
  0x8b   : > { %1476 = vmatmul.msk.bf16.gmra.mxu0 %vm375_vm1, %v1608_v31 }
  0x8c   : > { %1500 = vmatmul.msk.bf16.gmra.mxu1 %vm375_vm1, %v1607_v28  ;;  %1586 = vmatmul.msk.bf16.gmra.mxu2 %vm375_vm1, %v1626_v32 }
  0x98   : > { %v437_v35 = vpop.f32.mrf.mxu0 }
  0x99   : > { %v542_v36 = vpop.f32.mrf.mxu1 }
  0x9a   : > { %v543_v38 = vadd.f32 %v542_v36, %v437_v35 }
  0x9b   : > { %1477 = vmatmul.msk.bf16.gmra.mxu0 %vm375_vm1, %v1609_v34 }
  0x9c   : > { %1501 = vmatmul.msk.bf16.gmra.mxu1 %vm375_vm1, %v1608_v31  ;;  %1587 = vmatmul.msk.bf16.gmra.mxu2 %vm375_vm1, %v1627_v37 }
  0x9f   : > { %v802_v39 = vpop.f32.mrf.mxu2 }
  0xa0   : > { %v1921_v40 = vadd.f32 %v802_v39, %v543_v38  ;;  %v439_v41 = vpop.f32.mrf.mxu0 }
  0xa1   : > { %v544_v42 = vpop.f32.mrf.mxu1 }
  0xa2   : > { %v545_v43 = vadd.f32 %v544_v42, %v439_v41 }
  0xa7   : > { %v804_v44 = vpop.f32.mrf.mxu2 }
  0xa8   : > { %v1924_v46 = vadd.f32 %v804_v44, %v545_v43  ;;  %v442_v47 = vpop.f32.mrf.mxu0 }
  0xa9   : > { %v547_v48 = vpop.f32.mrf.mxu1 }
  0xaa   : > { %v548_v50 = vadd.f32 %v547_v48, %v442_v47 }
  0xab   : > { %1478 = vmatmul.msk.bf16.gmra.mxu0 %vm375_vm1, %v1610_v45 }
  0xac   : > { %1502 = vmatmul.msk.bf16.gmra.mxu1 %vm375_vm1, %v1609_v34  ;;  %1588 = vmatmul.msk.bf16.gmra.mxu2 %vm375_vm1, %v1628_v49 }
  0xaf   : > { %v807_v51 = vpop.f32.mrf.mxu2 }
  0xb0   : > { %v1930_v52 = vadd.f32 %v807_v51, %v548_v50  ;;  %v444_v53 = vpop.f32.mrf.mxu0 }
  0xb1   : > { %v549_v54 = vpop.f32.mrf.mxu1 }
  0xb2   : > { %v550_v55 = vadd.f32 %v549_v54, %v444_v53 }
  0xb7   : > { %v809_v56 = vpop.f32.mrf.mxu2 }
  0xb8   : > { %v1933_v58 = vadd.f32 %v809_v56, %v550_v55  ;;  %v447_v59 = vpop.f32.mrf.mxu0 }
  0xb9   : > { %v552_v60 = vpop.f32.mrf.mxu1 }
  0xba   : > { %v553_v62 = vadd.f32 %v552_v60, %v447_v59 }
  0xbb   : > { %1479 = vmatmul.msk.bf16.gmra.mxu0 %vm375_vm1, %v1611_v57 }
  0xbc   : > { %1503 = vmatmul.msk.bf16.gmra.mxu1 %vm375_vm1, %v1610_v45  ;;  %1589 = vmatmul.msk.bf16.gmra.mxu2 %vm375_vm1, %v1629_v61 }
  0xbf   : > { %v812_v63 = vpop.f32.mrf.mxu2 }
  0xc0   : > { %v1939_v0 = vadd.f32 %v812_v63, %v553_v62  ;;  %v449_v1 = vpop.f32.mrf.mxu0 }
  0xc1   : > { %v554_v2 = vpop.f32.mrf.mxu1 }
  0xc2   : > { %v555_v3 = vadd.f32 %v554_v2, %v449_v1 }
  0xc7   : > { %v814_v4 = vpop.f32.mrf.mxu2 }
  0xc8   : > { %v1942_v6 = vadd.f32 %v814_v4, %v555_v3  ;;  %v452_v7 = vpop.f32.mrf.mxu0 }
  0xc9   : > { %v557_v8 = vpop.f32.mrf.mxu1 }
  0xca   : > { %v558_v10 = vadd.f32 %v557_v8, %v452_v7 }
  0xcb   : > { %1480 = vmatmul.msk.bf16.gmra.mxu0 %vm375_vm1, %v1612_v5 }
  0xcc   : > { %1504 = vmatmul.msk.bf16.gmra.mxu1 %vm375_vm1, %v1611_v57  ;;  %1590 = vmatmul.msk.bf16.gmra.mxu2 %vm375_vm1, %v1630_v9  ;;  %v1974_v57 = vpop.f32.mrf.mxu3 }
  0xcf   : > { %v817_v11 = vpop.f32.mrf.mxu2 }
  0xd0   : > { %v1948_v12 = vadd.f32 %v817_v11, %v558_v10  ;;  %v454_v13 = vpop.f32.mrf.mxu0 }
  0xd1   : > { %v559_v14 = vpop.f32.mrf.mxu1 }
  0xd2   : > { %v560_v15 = vadd.f32 %v559_v14, %v454_v13 }
  0xd4   : > { %v1978_v1 = vpop.f32.mrf.mxu3 }
  0xd7   : > { %v819_v16 = vpop.f32.mrf.mxu2 }
  0xd8   : > { %v1951_v18 = vadd.f32 %v819_v16, %v560_v15  ;;  %v457_v19 = vpop.f32.mrf.mxu0 }
  0xd9   : > { %v562_v20 = vpop.f32.mrf.mxu1 }
  0xda   : > { %v563_v22 = vadd.f32 %v562_v20, %v457_v19 }
  0xdb   : > { %1481 = vmatmul.msk.bf16.gmra.mxu0 %vm375_vm1, %v1613_v17 }
  0xdc   : > { %1505 = vmatmul.msk.bf16.gmra.mxu1 %vm375_vm1, %v1612_v5  ;;  %1591 = vmatmul.msk.bf16.gmra.mxu2 %vm375_vm1, %v1631_v21  ;;  %v1984_v13 = vpop.f32.mrf.mxu3 }
  0xdf   : > { %v822_v23 = vpop.f32.mrf.mxu2 }
  0xe0   : > { %v1957_v24 = vadd.f32 %v822_v23, %v563_v22  ;;  %v459_v26 = vpop.f32.mrf.mxu0 }
  0xe1   : > { %v564_v27 = vpop.f32.mrf.mxu1 }
  0xe2   : > { %v565_v28 = vadd.f32 %v564_v27, %v459_v26 }
  0xe7   : > { %v824_v29 = vpop.f32.mrf.mxu2 }
  0xe8   : > { %v1959_v30 = vadd.f32 %v824_v29, %v565_v28  ;;  %v462_v31 = vpop.f32.mrf.mxu0 }
  0xe9   : > { %v567_v32 = vpop.f32.mrf.mxu1 }
  0xea   : > { %v568_v34 = vadd.f32 %v567_v32, %v462_v31 }
  0xeb   : > { %1482 = vmatmul.msk.bf16.gmra.mxu0 %vm375_vm1, %v1892_v25 }
  0xec   : > { %1506 = vmatmul.msk.bf16.gmra.mxu1 %vm375_vm1, %v1613_v17  ;;  %1592 = vmatmul.msk.bf16.gmra.mxu2 %vm375_vm1, %v1632_v33  ;;  %v1988_v17 = vpop.f32.mrf.mxu3  ;;  %v946_v33 = vadd.f32 %v1924_v46, %v1921_v40 }
  0xef   : > { %v827_v35 = vpop.f32.mrf.mxu2 }
  0xf0   : > { %v1966_v36 = vadd.f32 %v827_v35, %v568_v34  ;;  %v464_v37 = vpop.f32.mrf.mxu0  ;;  %v947_v35 = vadd.f32 %v946_v33, %v1930_v52  ;;  %v2071_v33 = vld [vmem:[%s2549_s4 + $0x50] sm:$0xff] }
  0xf1   : > { %v569_v38 = vpop.f32.mrf.mxu1 }
  0xf2   : > { %v570_v39 = vadd.f32 %v569_v38, %v464_v37 }
  0xf4   : > { %v1996_v22 = vpop.f32.mrf.mxu3 }
  0xf7   : > { %v829_v41 = vpop.f32.mrf.mxu2 }
  0xf8   : > { %v1968_v42 = vadd.f32 %v829_v41, %v570_v39  ;;  %v467_v43 = vpop.f32.mrf.mxu0  ;;  %v948_v39 = vadd.f32 %v947_v35, %v1933_v58 }
  0xf9   : > { %v572_v44 = vpop.f32.mrf.mxu1 }
  0xfa   : > { %2564 = vst [vmem:[#allocation5_spill] sm:$0xff] %v1968_v42  ;;  %v573_v45 = vadd.f32 %v572_v44, %v467_v43  ;;  %v949_v43 = vadd.f32 %v948_v39, %v1939_v0  ;;  %v2078_v39 = vld [vmem:[%s2549_s4 + $0x48] sm:$0xff] }
  0xfc   : > { %v2002_v28 = vpop.f32.mrf.mxu3  ;;  %v950_v44 = vadd.f32 %v949_v43, %v1942_v6 }
  0xff   : > { %v832_v47 = vpop.f32.mrf.mxu2 }
 0x100   : > { %v1970_v48 = vadd.f32 %v832_v47, %v573_v45  ;;  %v469_v25 = vpop.f32.mrf.mxu0  ;;  %v951_v47 = vadd.f32 %v950_v44, %v1948_v12 }
 0x101   : > { %v574_v49 = vpop.f32.mrf.mxu1 }
 0x102   : > { %2565 = vst [vmem:[#allocation6_spill] sm:$0xff] %v1970_v48  ;;  %v575_v50 = vadd.f32 %v574_v49, %v469_v25 }
 0x104   : > { %v2020_v41 = vpop.f32.mrf.mxu3 }
 0x107   : > { %v834_v51 = vpop.f32.mrf.mxu2 }
 0x108   : > { %v1972_v53 = vadd.f32 %v834_v51, %v575_v50  ;;  %v472_v54 = vpop.f32.mrf.mxu0  ;;  %v2034_v50 = vld [vmem:[%s2549_s4 + $0x78] sm:$0xff]  ;;  %v952_v51 = vadd.f32 %v951_v47, %v1951_v18  ;;  %v2087_v47 = vld [vmem:[%s2549_s4 + $0x40] sm:$0xff] }
 0x109   : > { %v577_v55 = vpop.f32.mrf.mxu1  ;;  %983 = vmatpush.msrb.mxu3 %v2034_v50 }
 0x10a   : > { %2566 = vst [vmem:[#allocation7_spill] sm:$0xff] %v1972_v53  ;;  %v578_v56 = vadd.f32 %v577_v55, %v472_v54  ;;  %v2041_v54 = vld [vmem:[%s2549_s4 + $0x70] sm:$0xff]  ;;  %v2046_v55 = vld [vmem:[%s2549_s4 + $0x68] sm:$0xff] }
 0x10b   : > { %984 = vmatpush.msrb.mxu3 %v2041_v54 }
 0x10d   : > { %985 = vmatpush.msrb.mxu3 %v2046_v55 }
 0x10f   : > { %v837_v59 = vpop.f32.mrf.mxu2 }
 0x110   : > { %v1976_v60 = vadd.f32 %v837_v59, %v578_v56  ;;  %v474_v61 = vpop.f32.mrf.mxu0  ;;  %v953_v56 = vadd.f32 %v952_v51, %v1957_v24  ;;  %v2050_v59 = vpop.f32.mrf.mxu3 }
 0x111   : > { %v579_v62 = vpop.f32.mrf.mxu1 }
 0x112   : > { %v580_v63 = vadd.f32 %v579_v62, %v474_v61  ;;  %v2055_v61 = vld [vmem:[%s2549_s4 + $0x60] sm:$0xff]  ;;  %v954_v62 = vadd.f32 %v953_v56, %v1959_v30 }
 0x113   : > { %986 = vmatpush.msrb.mxu3 %v2055_v61 }
 0x117   : > { %v839_v2 = vpop.f32.mrf.mxu2 }
 0x118   : > { %v1980_v3 = vadd.f32 %v839_v2, %v580_v63  ;;  %v477_v4 = vpop.f32.mrf.mxu0  ;;  %v955_v2 = vadd.f32 %v954_v62, %v1966_v36  ;;  %v2082_v44 = vpop.f32.mrf.mxu3 }
 0x119   : > { %v582_v5 = vpop.f32.mrf.mxu1 }
 0x11a   : > { %2567 = vst [vmem:[#allocation8_spill] sm:$0xff] %v1980_v3  ;;  %v583_v7 = vadd.f32 %v582_v5, %v477_v4 }
 0x11f   : > { %v842_v8 = vpop.f32.mrf.mxu2 }
 0x120   : > { %v1982_v9 = vadd.f32 %v842_v8, %v583_v7  ;;  %v479_v10 = vpop.f32.mrf.mxu0  ;;  %v2064_v7 = vld [vmem:[%s2549_s4 + $0x58] sm:$0xff]  ;;  %v956_v8 = vadd.f32 %v955_v2, %v1968_v42 }
 0x121   : > { %v584_v11 = vpop.f32.mrf.mxu1  ;;  %987 = vmatpush.msrb.mxu3 %v2064_v7 }
 0x122   : > { %v957_v35 = vadd.f32 %v956_v8, %v1970_v48  ;;  %v585_v62 = vadd.f32 %v584_v11, %v479_v10  ;;  %v2109_v10 = vld [vmem:[%s2549_s4 + $0x28] sm:$0xff] }
 0x123   : > { %988 = vmatpush.msrb.mxu3 %v2071_v33 }
 0x124   : > { %v958_v43 = vadd.f32 %v957_v35, %v1972_v53  ;;  %v2094_v35 = vld [vmem:[%s2549_s4 + $0x38] sm:$0xff] }
 0x125   : > { %989 = vmatpush.msrb.mxu3 %v2078_v39 }
 0x126   : > { %v959_v56 = vadd.f32 %v958_v43, %v1976_v60  ;;  %v2104_v43 = vld [vmem:[%s2549_s4 + $0x30] sm:$0xff] }
 0x127   : > { %v1986_v14 = vpop.f32.mrf.mxu2  ;;  %990 = vmatpush.msrb.mxu3 %v2087_v47 }
 0x128   : > { %v482_v15 = vpop.f32.mrf.mxu0  ;;  %v960_v53 = vadd.f32 %v959_v56, %v1980_v3  ;;  %v2099_v42 = vadd.f32 %v1986_v14, %v585_v62  ;;  %v2122_v56 = vld [vmem:[%s2549_s4 + $0x20] sm:$0xff] }
 0x129   : > { %v587_v16 = vpop.f32.mrf.mxu1  ;;  %991 = vmatpush.msrb.mxu3 %v2094_v35 }
 0x12a   : > { %v588_v2 = vadd.f32 %v587_v16, %v482_v15  ;;  %v961_v11 = vadd.f32 %v960_v53, %v1982_v9  ;;  %v2132_v53 = vld [vmem:[%s2549_s4 + $0x18] sm:$0xff] }
 0x12b   : > { %992 = vmatpush.msrb.mxu3 %v2104_v43 }
 0x12c   : > { %v962_v62 = vadd.f32 %v961_v11, %v2099_v42 }
 0x12d   : > { %993 = vmatpush.msrb.mxu3 %v2109_v10 }
 0x12f   : > { %v1990_v19 = vpop.f32.mrf.mxu2  ;;  %994 = vmatpush.msrb.mxu3 %v2122_v56 }
 0x130   : > { %v1992_v20 = vpop.f32.mrf.mxu0  ;;  %v2114_v15 = vadd.f32 %v1990_v19, %v588_v2  ;;  %v2146_v2 = vld [vmem:[%s2549_s4 + $0x10] sm:$0xff] }
 0x131   : > { %v1994_v21 = vpop.f32.mrf.mxu1  ;;  %995 = vmatpush.msrb.mxu3 %v2132_v53 }
 0x132   : > { %v590_v14 = vadd.f32 %v1994_v21, %v1992_v20  ;;  %v874_v20 = vpop.f32.mrf.mxu3  ;;  %v963_v21 = vadd.f32 %v962_v62, %v2114_v15 }
 0x133   : > { %996 = vmatpush.msrb.mxu3 %v2146_v2 }
 0x137   : > { %v1998_v23 = vpop.f32.mrf.mxu2 }
 0x138   : > { %v2000_v26 = vpop.f32.mrf.mxu0  ;;  %v2127_v3 = vadd.f32 %v1998_v23, %v590_v14 }
 0x139   : > { %v592_v27 = vpop.f32.mrf.mxu1 }
 0x13a   : > { %v593_v16 = vadd.f32 %v592_v27, %v2000_v26  ;;  %2568 = vst [vmem:[#allocation9_spill] sm:$0xff] %v2127_v3  ;;  %v964_v62 = vadd.f32 %v963_v21, %v2127_v3 }
 0x13f   : > { %v2004_v29 = vpop.f32.mrf.mxu2 }
 0x140   : > { %v2006_v31 = vpop.f32.mrf.mxu0  ;;  %v2137_v26 = vadd.f32 %v2004_v29, %v593_v16 }
 0x141   : > { %v2008_v32 = vpop.f32.mrf.mxu1 }
 0x142   : > { %v595_v27 = vadd.f32 %v2008_v32, %v2006_v31  ;;  %v2156_v31 = vld [vmem:[%s2549_s4 + $0x8] sm:$0xff]  ;;  %v965_v32 = vadd.f32 %v964_v62, %v2137_v26 }
 0x143   : > { %997 = vmatpush.msrb.mxu3 %v2156_v31 }
 0x147   : > { %v2012_v34 = vpop.f32.mrf.mxu2 }
 0x148   : > { %v2015_v37 = vpop.f32.mrf.mxu0  ;;  %v2151_v29 = vadd.f32 %v2012_v34, %v595_v27  ;;  %v2168_v34 = vld [vmem:[%s2549_s4] sm:$0xff] }
 0x149   : > { %v2017_v38 = vpop.f32.mrf.mxu1  ;;  %998 = vmatpush.msrb.mxu3 %v2168_v34 }
 0x14a   : > { %v598_v23 = vadd.f32 %v2017_v38, %v2015_v37  ;;  %v966_v21 = vadd.f32 %v965_v32, %v2151_v29 }
 0x14f   : > { %v2024_v45 = vpop.f32.mrf.mxu2 }
 0x150   : > { %v2027_v25 = vpop.f32.mrf.mxu0  ;;  %v2161_v37 = vadd.f32 %v2024_v45, %v598_v23 }
 0x151   : > { %v2029_v49 = vpop.f32.mrf.mxu1 }
 0x152   : > { %v600_v38 = vadd.f32 %v2029_v49, %v2027_v25  ;;  %v967_v45 = vadd.f32 %v966_v21, %v2161_v37 }
 0x157   : > { %v859_v63 = vpop.f32.mrf.mxu2 }
 0x158   : > { %v497_v4 = vpop.f32.mrf.mxu0  ;;  %v2172_v27 = vadd.f32 %v859_v63, %v600_v38  ;;  %v877_v63 = vpop.f32.mrf.mxu3  ;;  %v2204_v38 = vld [vmem:[%s2550_s5 + $0x60] sm:$0xff] }
 0x159   : > { %v602_v5 = vpop.f32.mrf.mxu1 }
 0x15a   : > { %v603_v16 = vadd.f32 %v602_v5, %v497_v4  ;;  %v2181_v4 = vld [vmem:[%s2550_s5 + $0x78] sm:$0xff]  ;;  %v2186_v5 = vld [vmem:[%s2550_s5 + $0x70] sm:$0xff]  ;;  %v968_v62 = vadd.f32 %v967_v45, %v2172_v27 }
 0x15b   : > { %1004 = vmatpush.msra.mxu3 %v2181_v4  ;;  %v2213_v45 = vld [vmem:[%s2550_s5 + $0x58] sm:$0xff] }
 0x15d   : > { %1005 = vmatpush.msra.mxu3 %v2186_v5 }
 0x15f   : > { %v862_v51 = vpop.f32.mrf.mxu2 }
 0x160   : > { %v499_v8 = vpop.f32.mrf.mxu0  ;;  %v2176_v23 = vadd.f32 %v862_v51, %v603_v16 }
 0x161   : > { %v604_v48 = vpop.f32.mrf.mxu1 }
 0x162   : > { %v605_v25 = vadd.f32 %v604_v48, %v499_v8  ;;  %v2195_v48 = vld [vmem:[%s2550_s5 + $0x68] sm:$0xff] }
 0x163   : > { %1006 = vmatpush.msra.mxu3 %v2195_v48 }
 0x165   : > { %1007 = vmatpush.msra.mxu3 %v2204_v38 }
 0x167   : > { %v864_v19 = vpop.f32.mrf.mxu2  ;;  %1008 = vmatpush.msra.mxu3 %v2213_v45 }
 0x168   : > { %v502_v11 = vpop.f32.mrf.mxu0  ;;  %v2190_v32 = vadd.f32 %v864_v19, %v605_v25  ;;  %v613_v19 = vadd.f32 %v1996_v22, %v1974_v57  ;;  %v615_v25 = vadd.f32 %v2002_v28, %v1978_v1  ;;  %v2224_v57 = vld [vmem:[%s2550_s5 + $0x50] sm:$0xff]  ;;  %v618_v22 = vadd.f32 %v2020_v41, %v1984_v13  ;;  %v939_v1 = vld [vmem:[%s2550_s5 + $0x48] sm:$0xff]  ;;  %v938_v13 = vld [vmem:[%s2550_s5 + $0x40] sm:$0xff]  ;;  %v879_v41 = vpop.f32.mrf.mxu3 }
 0x169   : > { %v607_v14 = vpop.f32.mrf.mxu1  ;;  %1009 = vmatpush.msra.mxu3 %v2224_v57  ;;  %v620_v28 = vadd.f32 %v2050_v59, %v1988_v17 }
 0x16a   : > { %v608_v49 = vadd.f32 %v607_v14, %v502_v11  ;;  %v969_v11 = vadd.f32 %v968_v62, %v2176_v23 }
 0x16b   : > { %1010 = vmatpush.msra.mxu3 %v939_v1  ;;  %v2251_v17 = vadd.f32 %v879_v41, %v620_v28 }
 0x16c   : > { %v970_v16 = vadd.f32 %v969_v11, %v2190_v32  ;;  %v2239_v11 = vadd.f32 %v874_v20, %v615_v25  ;;  %v936_v20 = vld [vmem:[%s2550_s5 + $0x30] sm:$0xff] }
 0x16d   : > { %1011 = vmatpush.msra.mxu3 %v938_v13 }
 0x16f   : > { %v867_v3 = vpop.f32.mrf.mxu2 }
 0x170   : > { %v504_v51 = vpop.f32.mrf.mxu0  ;;  %v2199_v14 = vadd.f32 %v867_v3, %v608_v49 }
 0x171   : > { %v609_v8 = vpop.f32.mrf.mxu1 }
 0x172   : > { %v610_v21 = vadd.f32 %v609_v8, %v504_v51  ;;  %v971_v49 = vadd.f32 %v970_v16, %v2199_v14  ;;  %v2230_v51 = vadd.f32 %v2082_v44, %v613_v19  ;;  %v2245_v44 = vadd.f32 %v877_v63, %v618_v22  ;;  %v935_v63 = vld [vmem:[%s2550_s5 + $0x28] sm:$0xff] }
 0x177   : > { %v869_v3 = vpop.f32.mrf.mxu2 }
 0x178   : > { %v2219_v62 = vadd.f32 %v869_v3, %v610_v21  ;;  %v937_v21 = vld [vmem:[%s2550_s5 + $0x38] sm:$0xff] }
 0x179   : > { %1012 = vmatpush.msra.mxu3 %v937_v21 }
 0x17a   : > { %v972_v8 = vadd.f32 %v971_v49, %v2219_v62  ;;  %v934_v49 = vld [vmem:[%s2550_s5 + $0x20] sm:$0xff] }
 0x17b   : > { %1013 = vmatpush.msra.mxu3 %v936_v20 }
 0x17c   : > { %v973_v16 = vadd.f32 %v972_v8, %v2230_v51  ;;  %v933_v8 = vld [vmem:[%s2550_s5 + $0x18] sm:$0xff] }
 0x17d   : > { %1014 = vmatpush.msra.mxu3 %v935_v63 }
 0x17e   : > { %v974_v19 = vadd.f32 %v973_v16, %v2239_v11  ;;  %v932_v16 = vld [vmem:[%s2550_s5 + $0x10] sm:$0xff] }
 0x17f   : > { %1015 = vmatpush.msra.mxu3 %v934_v49 }
 0x180   : > { %v975_v59 = vadd.f32 %v974_v19, %v2245_v44 }
 0x181   : > { %1016 = vmatpush.msra.mxu3 %v933_v8 }
 0x182   : > { %v976_v3 = vadd.f32 %v975_v59, %v2251_v17 }
 0x183   : > { %1017 = vmatpush.msra.mxu3 %v932_v16 }
 0x184   : > { %v977_v25 = vrot.slane %v976_v3, 4 }
 0x186   : > { %v978_v22 = vadd.f32 %v977_v25, %v976_v3  ;;  %v931_v3 = vld [vmem:[%s2550_s5 + $0x8] sm:$0xff]  ;;  %v930_v25 = vld [vmem:[%s2550_s5] sm:$0xff] }
 0x187   : > { %1018 = vmatpush.msra.mxu3 %v931_v3 }
 0x188   : > { %v979_v28 = vrot.slane %v978_v22, 2 }
 0x189   : > { %1019 = vmatpush.msra.mxu3 %v930_v25 }
 0x18a   : > { %v980_v41 = vadd.f32 %v979_v28, %v978_v22 }
 0x18c   : > { %v981_v19 = vrot.slane %v980_v41, 1 }
 0x18e   : > { %v982_v59 = vadd.f32 %v981_v19, %v980_v41 }
 0x190   : > { %999 = vmatmul.f32.vlgmr.msrb.gmra.mxu3 %v982_v59 }
 0x191   : > { %1126 = vmatpush.msrb.mxu3 %v2034_v50 }
 0x193   : > { %1127 = vmatpush.msrb.mxu3 %v2041_v54 }
 0x195   : > { %1128 = vmatpush.msrb.mxu3 %v2046_v55 }
 0x197   : > { %1129 = vmatpush.msrb.mxu3 %v2055_v61 }
 0x199   : > { %1130 = vmatpush.msrb.mxu3 %v2064_v7 }
 0x19b   : > { %1131 = vmatpush.msrb.mxu3 %v2071_v33 }
 0x19d   : > { %1132 = vmatpush.msrb.mxu3 %v2078_v39 }
 0x19f   : > { %1133 = vmatpush.msrb.mxu3 %v2087_v47 }
 0x1a1   : > { %1134 = vmatpush.msrb.mxu3 %v2094_v35 }
 0x1a3   : > { %1135 = vmatpush.msrb.mxu3 %v2104_v43 }
 0x1a5   : > { %1136 = vmatpush.msrb.mxu3 %v2109_v10 }
 0x1a7   : > { %1137 = vmatpush.msrb.mxu3 %v2122_v56 }
 0x1a9   : > { %1138 = vmatpush.msrb.mxu3 %v2132_v53 }
 0x1ab   : > { %1139 = vmatpush.msrb.mxu3 %v2146_v2 }
 0x1ad   : > { %1140 = vmatpush.msrb.mxu3 %v2156_v31 }
 0x1af   : > { %1141 = vmatpush.msrb.mxu3 %v2168_v34 }
 0x213   : > { %v1000_v50 = vpop.f32.mrf.mxu3 }
 0x214   : > { %v1003_v54 = vmul.f32 0.00390625, %v1000_v50 }
 0x216   : > { %1020 = vmatmul.f32.vlgmr.msra.gmra.mxu3 %v1003_v54 }
 0x217   : > { %1158 = vmatpush.msra.mxu3 %v2181_v4 }
 0x219   : > { %1159 = vmatpush.msra.mxu3 %v2186_v5 }
 0x21b   : > { %1160 = vmatpush.msra.mxu3 %v2195_v48 }
 0x21d   : > { %1161 = vmatpush.msra.mxu3 %v2204_v38 }
 0x21f   : > { %1162 = vmatpush.msra.mxu3 %v2213_v45 }
 0x221   : > { %1163 = vmatpush.msra.mxu3 %v2224_v57 }
 0x223   : > { %1164 = vmatpush.msra.mxu3 %v939_v1 }
 0x225   : > { %1165 = vmatpush.msra.mxu3 %v938_v13 }
 0x227   : > { %1166 = vmatpush.msra.mxu3 %v937_v21 }
 0x229   : > { %1167 = vmatpush.msra.mxu3 %v936_v20 }
 0x22b   : > { %1168 = vmatpush.msra.mxu3 %v935_v63 }
 0x22d   : > { %1169 = vmatpush.msra.mxu3 %v934_v49 }
 0x22f   : > { %1170 = vmatpush.msra.mxu3 %v933_v8 }
 0x231   : > { %1171 = vmatpush.msra.mxu3 %v932_v16  ;;  %v2569_v16 = vld [vmem:[#allocation5_spill] sm:$0xff] }
 0x233   : > { %1172 = vmatpush.msra.mxu3 %v931_v3  ;;  %v2570_v3 = vld [vmem:[#allocation6_spill] sm:$0xff] }
 0x235   : > { %1173 = vmatpush.msra.mxu3 %v930_v25 }
 0x299   : > { %v2298_v55 = vpop.f32.mrf.mxu3 }
 0x29a   : > { %v2301_v61 = vperm.slane %v2298_v55, 0 }
 0x29c   : > { %v1025_v7 = vsub.f32 %v1921_v40, %v2301_v61  ;;  %v1026_v33 = vsub.f32 %v1924_v46, %v2301_v61  ;;  %v1027_v39 = vsub.f32 %v1930_v52, %v2301_v61  ;;  %v1028_v43 = vsub.f32 %v1933_v58, %v2301_v61 }
 0x29d   : > { %v1029_v10 = vsub.f32 %v1939_v0, %v2301_v61  ;;  %v1030_v2 = vsub.f32 %v1942_v6, %v2301_v61  ;;  %v1031_v4 = vsub.f32 %v1948_v12, %v2301_v61  ;;  %v1032_v38 = vsub.f32 %v1951_v18, %v2301_v61 }
 0x29e   : > { %v1057_v47 = vmul.f32 %v1025_v7, %v1025_v7  ;;  %v1058_v35 = vmul.f32 %v1026_v33, %v1026_v33  ;;  %v1059_v56 = vmul.f32 %v1027_v39, %v1027_v39  ;;  %v1060_v31 = vmul.f32 %v1028_v43, %v1028_v43  ;;  %v2571_v7 = vld [vmem:[#allocation7_spill] sm:$0xff] }
 0x29f   : > { %v1061_v5 = vmul.f32 %v1029_v10, %v1029_v10  ;;  %v1062_v45 = vmul.f32 %v1030_v2, %v1030_v2  ;;  %v1033_v1 = vsub.f32 %v1957_v24, %v2301_v61  ;;  %v1063_v13 = vmul.f32 %v1031_v4, %v1031_v4 }
 0x2a0   : > { %v1089_v53 = vadd.f32 %v1058_v35, %v1057_v47  ;;  %v1034_v20 = vsub.f32 %v1959_v30, %v2301_v61  ;;  %v1064_v63 = vmul.f32 %v1032_v38, %v1032_v38  ;;  %v1035_v22 = vsub.f32 %v1966_v36, %v2301_v61 }
 0x2a1   : > { %v1065_v8 = vmul.f32 %v1033_v1, %v1033_v1  ;;  %v1036_v41 = vsub.f32 %v2569_v16, %v2301_v61  ;;  %v1037_v25 = vsub.f32 %v2570_v3, %v2301_v61  ;;  %v1038_v33 = vsub.f32 %v2571_v7, %v2301_v61 }
 0x2a2   : > { %v1090_v34 = vadd.f32 %v1089_v53, %v1059_v56  ;;  %v1066_v19 = vmul.f32 %v1034_v20, %v1034_v20  ;;  %v1067_v50 = vmul.f32 %v1035_v22, %v1035_v22  ;;  %v1039_v35 = vsub.f32 %v1976_v60, %v2301_v61  ;;  %v2572_v56 = vld [vmem:[#allocation8_spill] sm:$0xff] }
 0x2a3   : > { %v1068_v39 = vmul.f32 %v1036_v41, %v1036_v41  ;;  %v1069_v43 = vmul.f32 %v1037_v25, %v1037_v25  ;;  %v1040_v53 = vsub.f32 %v2572_v56, %v2301_v61  ;;  %v1070_v2 = vmul.f32 %v1038_v33, %v1038_v33 }
 0x2a4   : > { %v1091_v48 = vadd.f32 %v1090_v34, %v1060_v31  ;;  %v1041_v34 = vsub.f32 %v1982_v9, %v2301_v61  ;;  %v1071_v4 = vmul.f32 %v1039_v35, %v1039_v35  ;;  %v1045_v22 = vsub.f32 %v2137_v26, %v2301_v61 }
 0x2a5   : > { %v1072_v38 = vmul.f32 %v1040_v53, %v1040_v53  ;;  %v1046_v41 = vsub.f32 %v2151_v29, %v2301_v61  ;;  %v1047_v25 = vsub.f32 %v2161_v37, %v2301_v61  ;;  %v1048_v33 = vsub.f32 %v2172_v27, %v2301_v61 }
 0x2a6   : > { %v1092_v57 = vadd.f32 %v1091_v48, %v1061_v5  ;;  %v1042_v48 = vsub.f32 %v2099_v42, %v2301_v61  ;;  %v1073_v1 = vmul.f32 %v1041_v34, %v1041_v34  ;;  %v1049_v35 = vsub.f32 %v2176_v23, %v2301_v61 }
 0x2a7   : > { %v1050_v53 = vsub.f32 %v2190_v32, %v2301_v61  ;;  %v1051_v34 = vsub.f32 %v2199_v14, %v2301_v61 }
 0x2a8   : > { %v1093_v21 = vadd.f32 %v1092_v57, %v1062_v45  ;;  %v1043_v57 = vsub.f32 %v2114_v15, %v2301_v61 }
 0x2aa   : > { %v1094_v49 = vadd.f32 %v1093_v21, %v1063_v13  ;;  %v2573_v21 = vld [vmem:[#allocation9_spill] sm:$0xff] }
 0x2ab   : > { %v1044_v20 = vsub.f32 %v2573_v21, %v2301_v61 }
 0x2ac   : > { %v1095_v28 = vadd.f32 %v1094_v49, %v1064_v63  ;;  %v1074_v63 = vmul.f32 %v1042_v48, %v1042_v48  ;;  %v1052_v48 = vsub.f32 %v2219_v62, %v2301_v61 }
 0x2ae   : > { %v1096_v59 = vadd.f32 %v1095_v28, %v1065_v8  ;;  %v1075_v8 = vmul.f32 %v1043_v57, %v1043_v57  ;;  %v1053_v57 = vsub.f32 %v2230_v51, %v2301_v61 }
 0x2b0   : > { %v1097_v54 = vadd.f32 %v1096_v59, %v1066_v19  ;;  %v1076_v19 = vmul.f32 %v1044_v20, %v1044_v20  ;;  %v1054_v20 = vsub.f32 %v2239_v11, %v2301_v61 }
 0x2b2   : > { %v1098_v47 = vadd.f32 %v1097_v54, %v1067_v50  ;;  %v1077_v50 = vmul.f32 %v1045_v22, %v1045_v22  ;;  %v1055_v22 = vsub.f32 %v2245_v44, %v2301_v61 }
 0x2b4   : > { %v1099_v10 = vadd.f32 %v1098_v47, %v1068_v39  ;;  %v1078_v39 = vmul.f32 %v1046_v41, %v1046_v41  ;;  %v1056_v41 = vsub.f32 %v2251_v17, %v2301_v61 }
 0x2b6   : > { %v1100_v31 = vadd.f32 %v1099_v10, %v1069_v43  ;;  %v1079_v43 = vmul.f32 %v1047_v25, %v1047_v25  ;;  %v1087_v25 = vmul.f32 %v1055_v22, %v1055_v22  ;;  %v1180_v22 = vld [vmem:[%s2548_s3] sm:$0x1] }
 0x2b8   : > { %v1101_v5 = vadd.f32 %v1100_v31, %v1070_v2  ;;  %v1080_v2 = vmul.f32 %v1048_v33, %v1048_v33 }
 0x2ba   : > { %v1102_v45 = vadd.f32 %v1101_v5, %v1071_v4  ;;  %v1081_v4 = vmul.f32 %v1049_v35, %v1049_v35 }
 0x2bc   : > { %v1103_v13 = vadd.f32 %v1102_v45, %v1072_v38  ;;  %v1082_v38 = vmul.f32 %v1050_v53, %v1050_v53 }
 0x2be   : > { %v1104_v49 = vadd.f32 %v1103_v13, %v1073_v1  ;;  %v1083_v1 = vmul.f32 %v1051_v34, %v1051_v34 }
 0x2c0   : > { %v1105_v28 = vadd.f32 %v1104_v49, %v1074_v63  ;;  %v1084_v63 = vmul.f32 %v1052_v48, %v1052_v48 }
 0x2c2   : > { %v1106_v59 = vadd.f32 %v1105_v28, %v1075_v8  ;;  %v1085_v8 = vmul.f32 %v1053_v57, %v1053_v57 }
 0x2c4   : > { %v1107_v54 = vadd.f32 %v1106_v59, %v1076_v19  ;;  %v1086_v19 = vmul.f32 %v1054_v20, %v1054_v20 }
 0x2c6   : > { %v1108_v47 = vadd.f32 %v1107_v54, %v1077_v50  ;;  %v1088_v54 = vmul.f32 %v1056_v41, %v1056_v41 }
 0x2c8   : > { %v1109_v10 = vadd.f32 %v1108_v47, %v1078_v39 }
 0x2ca   : > { %v1110_v31 = vadd.f32 %v1109_v10, %v1079_v43 }
 0x2cc   : > { %v1111_v5 = vadd.f32 %v1110_v31, %v1080_v2 }
 0x2ce   : > { %v1112_v45 = vadd.f32 %v1111_v5, %v1081_v4 }
 0x2d0   : > { %v1113_v13 = vadd.f32 %v1112_v45, %v1082_v38 }
 0x2d2   : > { %v1114_v49 = vadd.f32 %v1113_v13, %v1083_v1  ;;  %v1178_v13 = vld [vmem:[%s2547_s2] sm:$0x1] }
 0x2d4   : > { %v1115_v28 = vadd.f32 %v1114_v49, %v1084_v63 }
 0x2d6   : > { %v1116_v59 = vadd.f32 %v1115_v28, %v1085_v8 }
 0x2d8   : > { %v1117_v50 = vadd.f32 %v1116_v59, %v1086_v19 }
 0x2da   : > { %v1118_v33 = vadd.f32 %v1117_v50, %v1087_v25 }
 0x2dc   : > { %v1119_v39 = vadd.f32 %v1118_v33, %v1088_v54 }
 0x2de   : > { %v1120_v47 = vrot.slane %v1119_v39, 4 }
 0x2e0   : > { %v1121_v35 = vadd.f32 %v1120_v47, %v1119_v39 }
 0x2e2   : > { %v1122_v43 = vrot.slane %v1121_v35, 2 }
 0x2e4   : > { %v1123_v10 = vadd.f32 %v1122_v43, %v1121_v35 }
 0x2e6   : > { %v1124_v53 = vrot.slane %v1123_v10, 1 }
 0x2e8   : > { %v1125_v2 = vadd.f32 %v1124_v53, %v1123_v10 }
 0x2ea   : > { %1142 = vmatmul.f32.vlgmr.msrb.gmra.mxu3 %v1125_v2 }
 0x36d   : > { %v1143_v31 = vpop.f32.mrf.mxu3 }
 0x36e   : > { %v1146_v34 = vmul.f32 0.00390625, %v1143_v31 }
 0x370   : > { %v1147_v4 = vadd.f32 1e-05, %v1146_v34 }
 0x372   : > { %1682 = vrsqrt.f32 %v1147_v4  ;;  %vm1154_vm3 = vweird.f32 %v1147_v4 }
 0x378   : > { %v1683_v5 = vpop.eup %1682 }
 0x379   : > { %v1149_v61 = vmul.f32 %v1683_v5, %v1147_v4  ;;  %vm1155_vm2 = vweird.f32 %v1683_v5 }
 0x37a   : > { %vm1156_vm4 = vmor %vm1154_vm3, %vm1155_vm2 }
 0x37b   : > { %v1150_v48 = vmul.f32 %v1683_v5, %v1149_v61 }
 0x37d   : > { %v1151_v38 = vmul.f32 0.5, %v1150_v48 }
 0x37f   : > { %v1152_v45 = vsub.f32 1.5, %v1151_v38 }
 0x381   : > { %v1153_v57 = vmul.f32 %v1683_v5, %v1152_v45 }
 0x383   : > { %v1157_v1 = vsel %vm1156_vm4, %v1683_v5, %v1153_v57 }
 0x384   : > { %1174 = vmatmul.f32.vlgmr.msra.gmra.mxu3 %v1157_v1 }
 0x407   : > { %v1175_v20 = vpop.f32.mrf.mxu3 }
 0x408   : > { %v1179_v63 = vmul.f32 %v1178_v13, %v1175_v20 }
 0x40a   : > { %v1181_v49 = vmul.f32 %v1179_v63, %v2298_v55  ;;  %v2374_v28 = vperm.slane %v1179_v63, 0 }
 0x40c   : > { %v1182_v8 = vsub.f32 %v1180_v22, %v1181_v49  ;;  %v1184_v19 = vmul.f32 %v2374_v28, %v1921_v40  ;;  %v1185_v59 = vmul.f32 %v2374_v28, %v1924_v46  ;;  %v1186_v25 = vmul.f32 %v2374_v28, %v1930_v52 }
 0x40d   : > { %v1187_v55 = vmul.f32 %v2374_v28, %v1933_v58  ;;  %v1188_v50 = vmul.f32 %v2374_v28, %v1939_v0  ;;  %v1189_v40 = vmul.f32 %v2374_v28, %v1942_v6  ;;  %v1190_v52 = vmul.f32 %v2374_v28, %v1948_v12 }
 0x40e   : > { %v2376_v41 = vperm.slane %v1182_v8, 0  ;;  %v1191_v47 = vmul.f32 %v2374_v28, %v1951_v18  ;;  %v1192_v35 = vmul.f32 %v2374_v28, %v1957_v24  ;;  %v1193_v53 = vmul.f32 %v2374_v28, %v1959_v30 }
 0x40f   : > { %v1194_v34 = vmul.f32 %v2374_v28, %v1966_v36  ;;  %v1195_v24 = vmul.f32 %v2374_v28, %v2569_v16  ;;  %v1196_v36 = vmul.f32 %v2374_v28, %v2570_v3  ;;  %v1197_v38 = vmul.f32 %v2374_v28, %v2571_v7 }
 0x410   : > { %v1219_v54 = vadd.f32 %v2376_v41, %v1184_v19  ;;  %v1220_v33 = vadd.f32 %v2376_v41, %v1185_v59  ;;  %v1221_v46 = vadd.f32 %v2376_v41, %v1186_v25  ;;  %v1222_v39 = vadd.f32 %v2376_v41, %v1187_v55 }
 0x411   : > { %v1223_v58 = vadd.f32 %v2376_v41, %v1188_v50  ;;  %v1224_v0 = vadd.f32 %v2376_v41, %v1189_v40  ;;  %v1225_v43 = vadd.f32 %v2376_v41, %v1190_v52  ;;  %v1226_v2 = vadd.f32 %v2376_v41, %v1191_v47 }
 0x412   : > { %v1251_v6 = vmax.f32 %v1219_v54, 0.0  ;;  %v1252_v10 = vmax.f32 %v1220_v33, 0.0  ;;  %v1253_v12 = vmax.f32 %v1221_v46, 0.0  ;;  %v1254_v31 = vmax.f32 %v1222_v39, 0.0 }
 0x413   : > { %v1227_v18 = vadd.f32 %v2376_v41, %v1192_v35  ;;  %v1255_v4 = vmax.f32 %v1223_v58, 0.0  ;;  %v1228_v30 = vadd.f32 %v2376_v41, %v1193_v53  ;;  %v1256_v5 = vmax.f32 %v1224_v0, 0.0 }
 0x414   : > { %1283 = vst [vmem:[%s2412_s26] sm:$0xff] %v1251_v6  ;;  %v1229_v61 = vadd.f32 %v2376_v41, %v1194_v34  ;;  %v1257_v48 = vmax.f32 %v1225_v43, 0.0  ;;  %v1230_v45 = vadd.f32 %v2376_v41, %v1195_v24  ;;  %v1258_v57 = vmax.f32 %v1226_v2, 0.0 }
 0x415   : > { %1284 = vst [vmem:[%s2412_s26 + $0x8] sm:$0xff] %v1252_v10  ;;  %v1198_v16 = vmul.f32 %v2374_v28, %v1976_v60  ;;  %v1231_v1 = vadd.f32 %v2376_v41, %v1196_v36  ;;  %v1259_v13 = vmax.f32 %v1227_v18, 0.0  ;;  %v1199_v3 = vmul.f32 %v2374_v28, %v2572_v56 }
 0x416   : > { %1285 = vst [vmem:[%s2412_s26 + $0x10] sm:$0xff] %v1253_v12  ;;  %v1232_v20 = vadd.f32 %v2376_v41, %v1197_v38  ;;  %v1260_v63 = vmax.f32 %v1228_v30, 0.0  ;;  %v1200_v7 = vmul.f32 %v2374_v28, %v1982_v9  ;;  %v1261_v22 = vmax.f32 %v1229_v61, 0.0 }
 0x417   : > { %1286 = vst [vmem:[%s2412_s26 + $0x18] sm:$0xff] %v1254_v31  ;;  %v1233_v49 = vadd.f32 %v2376_v41, %v1198_v16  ;;  %v1201_v60 = vmul.f32 %v2374_v28, %v2099_v42  ;;  %v1234_v8 = vadd.f32 %v2376_v41, %v1199_v3  ;;  %v1262_v19 = vmax.f32 %v1230_v45, 0.0 }
 0x418   : > { %1287 = vst [vmem:[%s2412_s26 + $0x20] sm:$0xff] %v1255_v4  ;;  %v1202_v56 = vmul.f32 %v2374_v28, %v2114_v15  ;;  %v1235_v59 = vadd.f32 %v2376_v41, %v1200_v7  ;;  %v1263_v25 = vmax.f32 %v1231_v1, 0.0  ;;  %v1203_v9 = vmul.f32 %v2374_v28, %v2573_v21 }
 0x419   : > { %1288 = vst [vmem:[%s2412_s26 + $0x28] sm:$0xff] %v1256_v5  ;;  %v1236_v55 = vadd.f32 %v2376_v41, %v1201_v60  ;;  %v1264_v50 = vmax.f32 %v1232_v20, 0.0  ;;  %v1204_v42 = vmul.f32 %v2374_v28, %v2137_v26  ;;  %v1265_v33 = vmax.f32 %v1233_v49, 0.0 }
 0x41a   : > { %1289 = vst [vmem:[%s2412_s26 + $0x30] sm:$0xff] %v1257_v48  ;;  %v1237_v54 = vadd.f32 %v2376_v41, %v1202_v56  ;;  %v1205_v15 = vmul.f32 %v2374_v28, %v2151_v29  ;;  %v1238_v40 = vadd.f32 %v2376_v41, %v1203_v9  ;;  %v1266_v46 = vmax.f32 %v1234_v8, 0.0 }
 0x41b   : > { %1290 = vst [vmem:[%s2412_s26 + $0x38] sm:$0xff] %v1258_v57  ;;  %v1206_v21 = vmul.f32 %v2374_v28, %v2161_v37  ;;  %v1239_v39 = vadd.f32 %v2376_v41, %v1204_v42  ;;  %v1267_v52 = vmax.f32 %v1235_v59, 0.0  ;;  %v1207_v26 = vmul.f32 %v2374_v28, %v2172_v27 }
 0x41c   : > { %1291 = vst [vmem:[%s2412_s26 + $0x40] sm:$0xff] %v1259_v13  ;;  %v1240_v58 = vadd.f32 %v2376_v41, %v1205_v15  ;;  %v1268_v47 = vmax.f32 %v1236_v55, 0.0  ;;  %v1208_v29 = vmul.f32 %v2374_v28, %v2176_v23  ;;  %v1269_v35 = vmax.f32 %v1237_v54, 0.0 }
 0x41d   : > { %1292 = vst [vmem:[%s2412_s26 + $0x48] sm:$0xff] %v1260_v63  ;;  %v1241_v0 = vadd.f32 %v2376_v41, %v1206_v21  ;;  %v1209_v37 = vmul.f32 %v2374_v28, %v2190_v32  ;;  %v1242_v43 = vadd.f32 %v2376_v41, %v1207_v26  ;;  %v1270_v6 = vmax.f32 %v1238_v40, 0.0 }
 0x41e   : > { %1293 = vst [vmem:[%s2412_s26 + $0x50] sm:$0xff] %v1261_v22  ;;  %v1210_v27 = vmul.f32 %v2374_v28, %v2199_v14  ;;  %v1243_v10 = vadd.f32 %v2376_v41, %v1208_v29  ;;  %v1271_v23 = vmax.f32 %v1239_v39, 0.0  ;;  %v1211_v53 = vmul.f32 %v2374_v28, %v2219_v62 }
 0x41f   : > { %1294 = vst [vmem:[%s2412_s26 + $0x58] sm:$0xff] %v1262_v19  ;;  %v1244_v2 = vadd.f32 %v2376_v41, %v1209_v37  ;;  %v1272_v32 = vmax.f32 %v1240_v58, 0.0  ;;  %v1212_v12 = vmul.f32 %v2374_v28, %v2230_v51  ;;  %v1273_v14 = vmax.f32 %v1241_v0, 0.0 }
 0x420   : > { %1295 = vst [vmem:[%s2412_s26 + $0x60] sm:$0xff] %v1263_v25  ;;  %v1245_v31 = vadd.f32 %v2376_v41, %v1210_v27  ;;  %v1213_v34 = vmul.f32 %v2374_v28, %v2239_v11  ;;  %v1246_v18 = vadd.f32 %v2376_v41, %v1211_v53  ;;  %v1274_v62 = vmax.f32 %v1242_v43, 0.0 }
 0x421   : > { %1296 = vst [vmem:[%s2412_s26 + $0x68] sm:$0xff] %v1264_v50  ;;  %v1214_v4 = vmul.f32 %v2374_v28, %v2245_v44  ;;  %v1247_v51 = vadd.f32 %v2376_v41, %v1212_v12  ;;  %v1275_v24 = vmax.f32 %v1243_v10, 0.0  ;;  %v1215_v30 = vmul.f32 %v2374_v28, %v2251_v17 }
 0x422   : > { %1297 = vst [vmem:[%s2412_s26 + $0x70] sm:$0xff] %v1265_v33  ;;  %v1248_v11 = vadd.f32 %v2376_v41, %v1213_v34  ;;  %v1276_v5 = vmax.f32 %v1244_v2, 0.0  ;;  %v1277_v61 = vmax.f32 %v1245_v31, 0.0  ;;  %v1278_v48 = vmax.f32 %v1246_v18, 0.0 }
 0x423   : > { %1298 = vst [vmem:[%s2412_s26 + $0x78] sm:$0xff] %v1266_v46  ;;  %v1249_v36 = vadd.f32 %v2376_v41, %v1214_v4  ;;  %v1250_v44 = vadd.f32 %v2376_v41, %v1215_v30  ;;  %v1279_v17 = vmax.f32 %v1247_v51, 0.0 }
 0x424   : > { %1299 = vst [vmem:[%s2412_s26 + $0x80] sm:$0xff] %v1267_v52  ;;  %v1280_v28 = vmax.f32 %v1248_v11, 0.0 }
 0x425   : > { %1300 = vst [vmem:[%s2412_s26 + $0x88] sm:$0xff] %v1268_v47  ;;  %v1281_v38 = vmax.f32 %v1249_v36, 0.0  ;;  %v1282_v45 = vmax.f32 %v1250_v44, 0.0 }
 0x426   : > { %1301 = vst [vmem:[%s2412_s26 + $0x90] sm:$0xff] %v1269_v35 }
 0x427   : > { %1302 = vst [vmem:[%s2412_s26 + $0x98] sm:$0xff] %v1270_v6 }
 0x428   : > { %1303 = vst [vmem:[%s2412_s26 + $0xa0] sm:$0xff] %v1271_v23 }
 0x429   : > { %1304 = vst [vmem:[%s2412_s26 + $0xa8] sm:$0xff] %v1272_v32 }
 0x42a   : > { %1305 = vst [vmem:[%s2412_s26 + $0xb0] sm:$0xff] %v1273_v14 }
 0x42b   : > { %1306 = vst [vmem:[%s2412_s26 + $0xb8] sm:$0xff] %v1274_v62 }
 0x42c   : > { %1307 = vst [vmem:[%s2412_s26 + $0xc0] sm:$0xff] %v1275_v24 }
 0x42d   : > { %1308 = vst [vmem:[%s2412_s26 + $0xc8] sm:$0xff] %v1276_v5 }
 0x42e   : > { %1309 = vst [vmem:[%s2412_s26 + $0xd0] sm:$0xff] %v1277_v61 }
 0x42f   : > { %1310 = vst [vmem:[%s2412_s26 + $0xd8] sm:$0xff] %v1278_v48 }
 0x430   : > { %1311 = vst [vmem:[%s2412_s26 + $0xe0] sm:$0xff] %v1279_v17 }
 0x431   : > { %1312 = vst [vmem:[%s2412_s26 + $0xe8] sm:$0xff] %v1280_v28 }
 0x432   : > { %1313 = vst [vmem:[%s2412_s26 + $0xf0] sm:$0xff] %v1281_v38 }
 0x433   : > { %1314 = vst [vmem:[%s2412_s26 + $0xf8] sm:$0xff] %v1282_v45 }
 0x434   : > { %1711 = shalt.err (!%p1708_p3)
}
 0x435   : > { %s1748_s19 = smov 128   ;;  %s1749_s26 = smov 8  }
 0x436   : > { %1641 = dma.vmem_to_hbm [thread:$0]  (%p1823_p5), %s1329_s10, 4096, %s1331_s11, %s1316_s12, %s1748_s19, %s1748_s19, %s1749_s26  }
 0x437 PF: > { %p1647_p4 = scmp.ge.s32.totalorder %s1746_s24, 2  ;;  %s1345_s28 = sand.u32 1, %s1734_s21  }
 0x438   : > { %s1346_s25 = scalar_lea.sflag [#allocation3], %s1345_s28 }
 0x439   : > { %p1644_p7 = pnand %p1647_p4, %p1827_p6 }
 0x43b   : > { %p1645_p8 = pneg %p1644_p7 }
 0x43d   : > { %1729 = dma.done.wait (%p1645_p8), %s1346_s25, 4096  }
 0x43e   : > { %1731 = vsyncadd (%p1645_p8), %s1346_s25, 4294963200  ;;  %p16_p9 = scmp.ge.s32.totalorder %s1810_s27, 4   ;;  %s2574_s21 = smov %s1738_s22 }
 0x43f   : > { %s2575_s22 = smov %s1742_s23  ;;  %s2576_s23 = smov %s1821_s30 }
 0x440   : > { %s2577_s24 = smov %s1810_s27  ;;  %18 = sbr.rel (!%p16_p9) target bundleno = 3 (0x3), region = 81 }
 0x445   :  { %1352 = vsyncpa [#allocation3], 1 }
 0x446   :  { %1354 = vsyncpa [#allocation3 + $0x1], 1 }

</bundles_post_ra>
